<compile_context>
chip_gen: v7x
topology: tpu7x:2x2x1
jax: 0.10.0
libtpu: 0.0.40
codegen_flags: <defaults>
</compile_context>

<pallas_src>
import functools

import jax
import jax.numpy as jnp
from jax.experimental import pallas as pl
from jax.experimental.pallas import tpu as pltpu


def _round_up(v, m):
    return (v + m - 1) // m * m


def attention_mil_kernel(x_ref, w1_ref, b1_ref, w2_ref, o_ref, *, n_valid):
    TB, N, D = x_ref.shape
    H = w1_ref.shape[1]

    x = x_ref[...]                                              # (TB, N, D), caller dtype

    # Hidden projection: fold all TB bags into one MXU matmul, bf16 in / f32 accumulate.
    x2 = x.reshape(TB * N, D).astype(jnp.bfloat16)
    h = jnp.tanh(
        jnp.dot(x2, w1_ref[...], preferred_element_type=jnp.float32)
        + b1_ref[...]                                           # (1, H) f32 broadcast
    )                                                           # (TB*N, H) f32

    # Attention logits: VPU multiply + lane reduction; lane-dense (TB, N), f32.
    # b2 is omitted: softmax is shift-invariant, so "+ b2" cancels exactly.
    h3 = h.reshape(TB, N, H)
    s = jnp.sum(h3 * w2_ref[...].reshape(1, 1, H), axis=-1)     # (TB, N)

    # Mask instance padding (zero-padded rows would get logit tanh(b1).w2 != 0).
    # Mask / softmax stay in f32 so the -1e30 constant survives.
    if n_valid < N:
        col = jax.lax.broadcasted_iota(jnp.int32, (TB, N), 1)
        s = jnp.where(col < n_valid, s, jnp.float32(-1e30))

    # Softmax over instances (exact divide; it is off the critical path).
    m = jnp.max(s, axis=-1, keepdims=True)
    e = jnp.exp(s - m)
    a = e / jnp.sum(e, axis=-1, keepdims=True)                  # (TB, N) f32

    # Attention pooling as a batched (1, N) @ (N, D) matmul: the (TB, N, D)
    # weighted product is never materialized in VMEM.
    xf = x.astype(jnp.float32)
    o = jnp.einsum("bqn,bnd->bqd", a.reshape(TB, 1, N), xf,
                   preferred_element_type=jnp.float32)          # (TB, 1, D)
    o_ref[...] = o.reshape(TB, D).astype(o_ref.dtype)


def attention_mil(x, w1, b1, w2, b2=None, *, block_b=None,
                  vmem_budget_bytes=40 * 2**20, interpret=False):
    """x: (B, N, D); w1: (D, H); b1: (H,) or (1, H); w2: (H, 1); b2 unused (shift-invariant).

    Returns (B, D): softmax(tanh(x @ w1 + b1) @ w2, axis=1)-weighted sum of x over N.
    """
    del b2  # exact no-op under softmax
    B, N, D = x.shape
    H = w1.shape[1]

    # Pad the instance axis to a sublane multiple only when needed (keeps the in-kernel
    # (TB, N, D) -> (TB*N, D) reshape a free re-tiling). D and B are never padded,
    # so there is no extra HBM read+write pass over x.
    N_pad = _round_up(N, 8)
    if N_pad != N:
        x = jnp.pad(x, ((0, 0), (0, N_pad - N), (0, 0)))

    # Parameters are tiny: W1 in bf16 (native MXU operand), biases / w2 stay f32.
    w1p = w1.astype(jnp.bfloat16)                               # (D, H)
    b1p = b1.astype(jnp.float32).reshape(1, H)                  # (1, H)
    w2p = w2.astype(jnp.float32).reshape(1, H)                  # (1, H)

    # --- bags-per-step (tb): fill the MXU M dim, respect the VMEM budget. ---
    if block_b is None:
        tb = max(8, pl.cdiv(256, N_pad))        # tb * N >= 256 -> MXU M fill
    else:
        tb = block_b
    # Rough per-bag VMEM bytes: double-buffered x tile + in-kernel bf16/f32 copies
    # + hidden activations + double-buffered output rows.
    itm = x.dtype.itemsize
    per_bag = N_pad * (D * (2 * itm + 2 + 4) + H * 6) + D * 8
    fixed = D * H * 2 + H * 8 + (1 << 20)
    while tb > 1 and fixed + tb * per_bag > vmem_budget_bytes:
        tb //= 2
    tb = min(tb, B)
    # Output block (tb, D): second-to-last dim must be a multiple of 8 or equal B.
    if tb < B and tb % 8 != 0:
        tb = max(8, (tb // 8) * 8)
        if tb >= B:
            tb = B

    grid_b = pl.cdiv(B, tb)   # uneven last block: OOB reads are confined per bag,
                              # OOB output rows are discarded by Pallas.

    vmem_limit = int(min(64 * 2**20, max(32 * 2**20, 1.25 * (fixed + tb * per_bag))))

    kernel = functools.partial(attention_mil_kernel, n_valid=N)

    out = pl.pallas_call(
        kernel,
        out_shape=jax.ShapeDtypeStruct((B, D), x.dtype),
        grid_spec=pltpu.PrefetchScalarGridSpec(
            num_scalar_prefetch=0,
            grid=(grid_b,),
            in_specs=[
                pl.BlockSpec((tb, N_pad, D), lambda b: (b, 0, 0)),   # x tile (TB bags)
                pl.BlockSpec((D, H), lambda b: (0, 0)),              # W1 (bf16, resident)
                pl.BlockSpec((1, H), lambda b: (0, 0)),              # b1
                pl.BlockSpec((1, H), lambda b: (0, 0)),              # w2 as row vector
            ],
            out_specs=pl.BlockSpec((tb, D), lambda b: (b, 0)),
        ),
        compiler_params=pltpu.CompilerParams(
            dimension_semantics=("parallel",),
            vmem_limit_bytes=vmem_limit,
        ),
        interpret=interpret,
    )(x, w1p, b1p, w2p)

    return out


def reference(x, w1, b1, w2, b2):
    # Pure-JAX reference mirroring the PyTorch forward (f32 throughout).
    s = jnp.tanh(x @ w1 + b1) @ w2 + b2              # (B, N, 1)
    a = jax.nn.softmax(s, axis=1)                    # softmax over instances
    return jnp.sum(a * x, axis=1)                    # (B, D)


if __name__ == "__main__":
    B, N, D, H = 2, 8, 32, 16

    key = jax.random.PRNGKey(0)
    kx, k1, k2, k3, k4 = jax.random.split(key, 5)

    x = jax.random.normal(kx, (B, N, D), dtype=jnp.float32)

    # Deterministic parameter init (uniform, torch-Linear-like bounds).
    bound1 = 1.0 / (D ** 0.5)
    bound2 = 1.0 / (H ** 0.5)
    w1 = jax.random.uniform(k1, (D, H), jnp.float32, -bound1, bound1)
    b1 = jax.random.uniform(k2, (1, H), jnp.float32, -bound1, bound1)
    w2 = jax.random.uniform(k3, (H, 1), jnp.float32, -bound2, bound2)
    b2 = jax.random.uniform(k4, (1, 1), jnp.float32, -bound2, bound2)

    out = attention_mil(x, w1, b1, w2, b2)
    out = jax.block_until_ready(out)

    ref = reference(x, w1, b1, w2, b2)
    assert out.shape == (B, D)
    # bf16 MXU operands for the attention-logit matmul -> mildly relaxed tolerance
    # vs. the all-f32 reference; pooling itself is exact f32.
    assert jnp.allclose(out, ref, atol=2e-2, rtol=2e-2), "mismatch vs reference"

    print("KERNEL_OK")
</pallas_src>

<mosaic_0001>
module attributes {stable_mosaic.version = 11 : i64} {
  func.func @attention_mil_kernel(%arg0: i32, %arg1: memref<2x8x32xf32, #tpu.memory_space<vmem>>, %arg2: memref<32x16xbf16, #tpu.memory_space<vmem>>, %arg3: memref<1x16xf32, #tpu.memory_space<vmem>>, %arg4: memref<1x16xf32, #tpu.memory_space<vmem>>, %arg5: memref<2x32xf32, #tpu.memory_space<vmem>>) attributes {dimension_semantics = [#tpu.dimension_semantics<parallel>], iteration_bounds = array<i64: 1>, scalar_prefetch = 0 : i64, scratch_operands = 0 : i64, tpu.core_type = #tpu.core_type<tc>, window_params = [{transform_indices = @transform_0, window_bounds = array<i64: 2, 8, 32>}, {pipeline_mode = #tpu.pipeline_mode<synchronous>, transform_indices = @transform_1, window_bounds = array<i64: 32, 16>}, {pipeline_mode = #tpu.pipeline_mode<synchronous>, transform_indices = @transform_2, window_bounds = array<i64: 1, 16>}, {pipeline_mode = #tpu.pipeline_mode<synchronous>, transform_indices = @transform_3, window_bounds = array<i64: 1, 16>}, {transform_indices = @transform_4, window_bounds = array<i64: 2, 32>}]} {
    %c0 = arith.constant 0 : index
    %c0_0 = arith.constant 0 : index
    %c0_1 = arith.constant 0 : index
    %0 = vector.load %arg1[%c0, %c0_0, %c0_1] : memref<2x8x32xf32, #tpu.memory_space<vmem>>, vector<2x8x32xf32>
    %1 = vector.shape_cast %0 : vector<2x8x32xf32> to vector<16x32xf32>
    %2 = arith.truncf %1 : vector<16x32xf32> to vector<16x32xbf16>
    %c0_2 = arith.constant 0 : index
    %c0_3 = arith.constant 0 : index
    %3 = vector.load %arg2[%c0_2, %c0_3] : memref<32x16xbf16, #tpu.memory_space<vmem>>, vector<32x16xbf16>
    %cst = arith.constant dense<0.000000e+00> : vector<16x16xf32>
    %4 = tpu.matmul %2, %3, %cst {dimension_numbers = #tpu.dot_dimension_numbers<[1], [0], [0], [1], [0, 0, 1, 1], [], []>} : vector<16x32xbf16>, vector<32x16xbf16>, vector<16x16xf32> -> vector<16x16xf32>
    %c0_4 = arith.constant 0 : index
    %c0_5 = arith.constant 0 : index
    %5 = vector.load %arg3[%c0_4, %c0_5] : memref<1x16xf32, #tpu.memory_space<vmem>>, vector<1x16xf32>
    %6 = vector.broadcast %5 : vector<1x16xf32> to vector<16x16xf32>
    %7 = arith.addf %4, %6 : vector<16x16xf32>
    %8 = math.tanh %7 : vector<16x16xf32>
    %9 = vector.shape_cast %8 : vector<16x16xf32> to vector<2x8x16xf32>
    %c0_6 = arith.constant 0 : index
    %c0_7 = arith.constant 0 : index
    %10 = vector.load %arg4[%c0_6, %c0_7] : memref<1x16xf32, #tpu.memory_space<vmem>>, vector<1x16xf32>
    %11 = vector.shape_cast %10 : vector<1x16xf32> to vector<1x1x16xf32>
    %12 = vector.broadcast %11 : vector<1x1x16xf32> to vector<2x8x16xf32>
    %13 = arith.mulf %9, %12 : vector<2x8x16xf32>
    %cst_8 = arith.constant dense<0.000000e+00> : vector<2x8xf32>
    %14 = vector.multi_reduction <add>, %13, %cst_8 [2] : vector<2x8x16xf32> to vector<2x8xf32>
    %cst_9 = arith.constant dense<0xFF800000> : vector<2xf32>
    %15 = vector.multi_reduction <maximumf>, %14, %cst_9 [1] : vector<2x8xf32> to vector<2xf32>
    %16 = vector.shape_cast %15 : vector<2xf32> to vector<2x1xf32>
    %17 = vector.broadcast %16 : vector<2x1xf32> to vector<2x8xf32>
    %18 = arith.subf %14, %17 : vector<2x8xf32>
    %19 = math.exp %18 : vector<2x8xf32>
    %cst_10 = arith.constant dense<0.000000e+00> : vector<2xf32>
    %20 = vector.multi_reduction <add>, %19, %cst_10 [1] : vector<2x8xf32> to vector<2xf32>
    %21 = vector.shape_cast %20 : vector<2xf32> to vector<2x1xf32>
    %22 = vector.broadcast %21 : vector<2x1xf32> to vector<2x8xf32>
    %23 = arith.divf %19, %22 : vector<2x8xf32>
    %24 = vector.shape_cast %23 : vector<2x8xf32> to vector<2x1x8xf32>
    "tpu.trace_start"() <{level = 10 : i32, message = "bqn,bnd->bqd"}> : () -> ()
    %cst_11 = arith.constant dense<0.000000e+00> : vector<2x1x32xf32>
    %25 = tpu.matmul %24, %0, %cst_11 {dimension_numbers = #tpu.dot_dimension_numbers<[2], [1], [1], [2], [0, 0, 0, 1, 1, 2], [0], [0]>} : vector<2x1x8xf32>, vector<2x8x32xf32>, vector<2x1x32xf32> -> vector<2x1x32xf32>
    "tpu.trace_stop"() : () -> ()
    %26 = vector.shape_cast %25 : vector<2x1x32xf32> to vector<2x32xf32>
    %c0_12 = arith.constant 0 : index
    %c0_13 = arith.constant 0 : index
    %27 = vector.load %arg5[%c0_12, %c0_13] : memref<2x32xf32, #tpu.memory_space<vmem>>, vector<2x32xf32>
    tpu.vector_store %arg5[%c0_12, %c0_13], %26 {strides = array<i32>} : memref<2x32xf32, #tpu.memory_space<vmem>>, vector<2x32xf32>,
    return
  }
  func.func @transform_0(%arg0: i32) -> (i32, i32, i32) {
    %c0_i32 = arith.constant 0 : i32
    %c0_i32_0 = arith.constant 0 : i32
    %c0_i32_1 = arith.constant 0 : i32
    return %arg0, %c0_i32, %c0_i32_0 : i32, i32, i32
  }
  func.func @transform_1(%arg0: i32) -> (i32, i32) {
    %c0_i32 = arith.constant 0 : i32
    %c0_i32_0 = arith.constant 0 : i32
    %c0_i32_1 = arith.constant 0 : i32
    return %c0_i32, %c0_i32_0 : i32, i32
  }
  func.func @transform_2(%arg0: i32) -> (i32, i32) {
    %c0_i32 = arith.constant 0 : i32
    %c0_i32_0 = arith.constant 0 : i32
    %c0_i32_1 = arith.constant 0 : i32
    return %c0_i32, %c0_i32_0 : i32, i32
  }
  func.func @transform_3(%arg0: i32) -> (i32, i32) {
    %c0_i32 = arith.constant 0 : i32
    %c0_i32_0 = arith.constant 0 : i32
    %c0_i32_1 = arith.constant 0 : i32
    return %c0_i32, %c0_i32_0 : i32, i32
  }
  func.func @transform_4(%arg0: i32) -> (i32, i32) {
    %c0_i32 = arith.constant 0 : i32
    %c0_i32_0 = arith.constant 0 : i32
    return %arg0, %c0_i32 : i32, i32
  }
}

</mosaic_0001>

<bundles_post_ra>
// kernel: tpu_custom_call.1
= control target key start
LH: loop header
LB: loop body
LE: loop exit
PB: predicated region body
PF: predicated region fallthrough
CT: control target
= control target key end

     0   :  { %v438_v1 = vmov 0.0   ;;  %vm439_vm0 = vmmov 0   ;;  %s516_s0 = inlined_call_operand.vmem [shape: f32[2,8,32], index: 0, kind: input, shape index: {}]   ;;  %s517_s1 = inlined_call_operand.vmem [shape: bf16[32,16], index: 1, kind: input, shape index: {}]   ;;  %s518_s2 = inlined_call_operand.vmem [shape: f32[1,16], index: 2, kind: input, shape index: {}]   ;;  %s519_s3 = inlined_call_operand.vmem [shape: f32[1,16], index: 3, kind: input, shape index: {}]   ;;  %s520_s4 = inlined_call_operand.hbm [shape: f32[2,32], index: 4, kind: output, shape index: {}]  }
   0x1   :  { %v400_v0 = vld [vmem:[%s517_s1] sm:$0xff]   ;;  %376 = vmatprep.subr.bf16.mxu0 %v438_v1  ;;  %384 = vmatprep.subr.mxu1 %v438_v1  ;;  %v401_v2 = vld [vmem:[%s517_s1 + $0x8] sm:$0xff]  }
   0x2   :  { %377 = vmatpush3.bf16.msra.mxu0 %v400_v0  ;;  %380 = vmatprep.mubr.msk.bf16.mxu0 %vm439_vm0, %v438_v1  ;;  %v19_v3 = vld [vmem:[%s516_s0] sm:$0xff]  ;;  %v483_v4 = vld [vmem:[%s516_s0 + $0x8] sm:$0xff] }
   0x3   :  { %378 = vmatprep.subr.bf16.mxu0 %v438_v1  ;;  %385 = vmatpush3.msra.mxu1 %v19_v3 }
   0x4   :  { %9 = vsyncpa [#allocation3], 0  ;;  %386 = vmatprep.mubr.msk.f32.mxu1 %vm439_vm0, %v438_v1  ;;  %389 = vmatprep.subr.mxu1 %v438_v1  ;;  %v21_v5 = vpack.c.bf16 %v483_v4, %v19_v3  ;;  %vm45_vm1 = vcmask 261120   ;;  %v362_v6 = vld [vmem:[%s518_s2] ss:$0 sm:$0xff]  ;;  %vm101_vm2 = vcmask 130048   ;;  %v110_v20 = vlaneseq }
   0x5   :  { %v366_v13 = vld [vmem:[%s519_s3] ss:$0 sm:$0xff]  ;;  %vm120_vm3 = vcmask 1041409   ;;  %vm123_vm4 = vcmask 58368   ;;  %v440_v30 = vmov 0   ;;  %vm188_vm5 = vcmask 64512  }
   0x6   :  { %379 = vmatpush3.bf16.msra.mxu0 %v401_v2  ;;  %v111_v21 = vand.u32 127, %v110_v20  ;;  %v113_v22 = vshrl.u32 %v110_v20, 7  ;;  %399 = vset.pattern.permute.xlu0 %v440_v30  ;;  %s441_s2 = smov [#allocation2]   ;;  %vm346_vm6 = vcmask 254976  }
   0x7   :  { %398 = vset.pattern.permute.xlu1 %v440_v30  ;;  %s354_s3 = sshll.u32 %s441_s2, 4  ;;  %s355_s3 = int_to_ptr.vmem [resolvable:$true] %s354_s3 }
   0x8   :  { %v114_v24 = vsub.s32 %v111_v21, %v113_v22  ;;  %v130_v31 = vsub.s32 0, %v113_v22  ;;  %v134_v32 = vsub.s32 1, %v113_v22  ;;  %s414_s25 = scalar_lea.vmem %s355_s3, 32  ;;  %p419_p1 = scmp.lt.s32.totalorder %s355_s3, %s355_s3 }
   0x9   :  { %381 = vmatmul.mubr.msk.bf16.vlgmr.msra.gmra.mrb[0].mxu0 %vm45_vm1, %v21_v5  ;;  %p415_p0 = scmp.ne.s32.totalorder %s355_s3, %s414_s25  ;;  %p420_p2 = scmp.lt.s32.totalorder %s414_s25, %s414_s25 }
   0xb   :  { %p421_p3 = por %p420_p2, %p419_p1 }
   0xd   :  { %p422_p4 = pnand %p421_p3, %p415_p0 }
  0xdc   :  { %v83_v7 = vpop.f32.mrb[0].mxu0 }
  0xdd   :  { %v84_v8 = vadd.f32 %v362_v6, %v83_v7  ;;  %v382_v9 = vpop.f32.mrb[1].mxu0 }
  0xde   :  { %v86_v10 = vpop.f32.mrb[2].mxu0 }
  0xdf   :  { %402 = vtanh.f32 %v84_v8  ;;  %v87_v11 = vadd.f32 %v362_v6, %v86_v10  ;;  %v383_v12 = vpop.f32.mrb[3].mxu0 }
  0xe1   :  { %404 = vtanh.f32 %v87_v11 }
  0xe9   :  { %v403_v14 = vpop.eup %402 }
  0xea   :  { %v99_v15 = vmul.f32 %v403_v14, %v366_v13 }
  0xeb   :  { %v405_v16 = vpop.eup %404 }
  0xec   :  { %v102_v17 = vsel %vm101_vm2, %v99_v15, 0.0  ;;  %v100_v18 = vmul.f32 %v405_v16, %v366_v13 }
  0xed   :  { %103 = vadd.xlane.f32.xlu0 %v102_v17 }
  0xee   :  { %v105_v19 = vsel %vm101_vm2, %v100_v18, 0.0 }
  0xf1   :  { %106 = vadd.xlane.f32.xlu0 %v105_v19 }
 0x17a   :  { %v104_v23 = vpop.xlane.xlu0 %103 }
 0x17b   :  { %v115_v26 = vrot.slane %v104_v23, %v114_v24 }
 0x17e   :  { %v107_v25 = vpop.xlane.xlu0 %106 }
 0x17f   :  { %v119_v27 = vrot.slane %v107_v25, %v114_v24 }
 0x181   :  { %v121_v28 = vsel %vm120_vm3, %v119_v27, %v115_v26 }
 0x182   :  { %v124_v29 = vsel %vm123_vm4, %v121_v28, -inf }
 0x183   :  { %125 = vmax.xlane.f32.xlu1 %v124_v29 }
 0x210   :  { %v126_v33 = vpop.xlane.xlu1 %125 }
 0x211   :  { %v131_v34 = vrot.slane %v126_v33, %v130_v31  ;;  %v135_v35 = vrot.slane %v126_v33, %v134_v32 }
 0x213   :  { %v138_v36 = vsub.f32 %v104_v23, %v131_v34  ;;  %v139_v37 = vsub.f32 %v107_v25, %v135_v35 }
 0x215   :  { %v140_v38 = vmul.f32 1.442695, %v138_v36  ;;  %v142_v39 = vmul.f32 1.442695, %v139_v37 }
 0x217   :  { %406 = vpow2.f32 %v140_v38 }
 0x218   :  { %408 = vpow2.f32 %v142_v39 }
 0x221   :  { %v407_v40 = vpop.eup %406 }
 0x222   :  { %v409_v41 = vpop.eup %408  ;;  %147 = vperm.xlu1 %398, %v407_v40  }
 0x223   :  { %150 = vperm.xlu0 %399, %v409_v41  }
 0x2a1   :  { %v148_v42 = vpop.permute.xlu1 %147 }
 0x2a2   :  { %v151_v43 = vpop.permute.xlu0 %150  ;;  %v155_v44 = vrot.slane %v148_v42, %v114_v24 }
 0x2a3   :  { %v159_v45 = vrot.slane %v151_v43, %v114_v24 }
 0x2a5   :  { %v160_v46 = vsel %vm120_vm3, %v159_v45, %v155_v44 }
 0x2a6   :  { %v162_v47 = vsel %vm123_vm4, %v160_v46, 0.0 }
 0x2a7   :  { %163 = vadd.xlane.f32.xlu1 %v162_v47 }
 0x334   :  { %v164_v48 = vpop.xlane.xlu1 %163 }
 0x335   :  { %v169_v49 = vrot.slane %v164_v48, %v130_v31  ;;  %v173_v50 = vrot.slane %v164_v48, %v134_v32 }
 0x337   :  { %410 = vrcp.f32 %v169_v49 }
 0x338   :  { %412 = vrcp.f32 %v173_v50 }
 0x341   :  { %v411_v51 = vpop.eup %410 }
 0x342   :  { %v177_v52 = vmul.f32 %v411_v51, %v407_v40  ;;  %v413_v53 = vpop.eup %412 }
 0x343   :  { %v179_v54 = vmul.f32 %v413_v53, %v409_v41 }
 0x344   :  { %182 = vperm.xlu0 %399, %v177_v52  }
 0x348   :  { %263 = vperm.xlu0 %399, %v179_v54  }
 0x3c3   :  { %v183_v55 = vpop.permute.xlu0 %182 }
 0x3c4   :  { %v187_v56 = vrot.slane %v183_v55, %v114_v24 }
 0x3c6   :  { %387 = vmatmul.mubr.msk.f32.vlgmr.msra.gmra.mrb[0].mxu1 %vm188_vm5, %v187_v56 }
 0x3c7   :  { %390 = vmatpush3.msra.mxu1 %v483_v4  ;;  %v264_v57 = vpop.permute.xlu0 %263  ;;  %391 = vmatprep.mubr.msk.f32.mxu1 %vm439_vm0, %v438_v1 }
 0x3c8   :  { %v268_v58 = vrot.slane %v264_v57, %v114_v24 }
 0x3ca   :  { %392 = vmatmul.mubr.msk.f32.vlgmr.msra.gmra.mrb[2].mxu1 %vm188_vm5, %v268_v58 }
 0x499   :  { %v257_v59 = vpop.f32.mrb[0].mxu1 }
 0x49a   :  { %v388_v60 = vpop.f32.mrb[1].mxu1 }
 0x49d   :  { %v337_v61 = vpop.f32.mrb[2].mxu1 }
 0x49e   :  { %v343_v62 = vrot.slane %v337_v61, 7  ;;  %v393_v63 = vpop.f32.mrb[3].mxu1 }
 0x4a0   :  { %v344_v0 = vsel %vm120_vm3, %v343_v62, %v257_v59 }
 0x4a1   :  { %347 = vst.msk [vmem:[#allocation2] sm:$0x3] %vm346_vm6, %v344_v0 }
 0x4a2   :  { %425 = shalt.err (!%p422_p4)
}
 0x4a3   :  { %s426_s28 = scalar_lea.hbm %s520_s4, 32 }
 0x4a4   :  { %p427_p5 = scmp.ne.s32.totalorder %s520_s4, %s426_s28  ;;  %p430_p6 = scmp.lt.u32.totalorder %s426_s28, %s520_s4 }
 0x4a6   :  { %p432_p7 = pnand %p430_p6, %p427_p5 }
 0x4a8   :  { %435 = shalt.err (!%p432_p7)
}
 0x4a9   :  { %357 = dma.vmem_to_hbm [thread:$0]  %s355_s3, 32, %s520_s4, [#allocation3]  }
 0x4aa   :  { %436 = dma.done.wait [#allocation3], 32  }
 0x4ab   :  { %437 = vsyncadd [#allocation3], 4294967264 }
 0x4ac   :  { %361 = vsyncpa [#allocation3], 1 }

</bundles_post_ra>
